<compile_context>
chip_gen: v6e
topology: v6e:2x2x1
jax: 0.10.0
libtpu: 0.0.40
codegen_flags: <defaults>
</compile_context>

<pallas_src>
import jax
import jax.numpy as jnp
from jax.experimental import pallas as pl
from jax.experimental.pallas import tpu as pltpu


def _round_up(n, m):
    return ((n + m - 1) // m) * m


def _discriminator_kernel(x_ref, w1_ref, b1_ref, w2_ref, b2_ref, o_ref):
    # x_ref : (TB, 784)  native dtype (f32 here)  VMEM, tiled over batch
    # w1_ref: (784, 128) bf16  VMEM (resident across grid steps)
    # b1_ref: (1, 128)   f32   VMEM (resident)
    # w2_ref: (1, 128)   f32   VMEM (resident) -- layer-2 weight as a row
    # b2_ref: (1,)       f32   SMEM scalar
    # o_ref : (TB, 1)    f32   VMEM
    #
    # In-kernel bf16 cast (VPU, hidden under the x DMA), then MXU matmul with
    # f32 accumulation and an f32 epilogue.
    x = x_ref[...].astype(jnp.bfloat16)
    h = jnp.dot(x, w1_ref[...], preferred_element_type=jnp.float32)
    h = jnp.maximum(h + b1_ref[...], 0.0)                       # bias + ReLU
    # Layer 2 (128 -> 1): VPU multiply + XLU lane reduction instead of an MXU
    # matmul that would use 1 of 256 result columns.
    y = jnp.sum(h * w2_ref[...], axis=-1, keepdims=True) + b2_ref[0]
    o_ref[...] = jax.nn.sigmoid(y).astype(o_ref.dtype)          # EUP


def discriminator_forward(x, w1, b1, w2, b2, *, tb=1024, x_buffers=2,
                          core_parallel=False):
    """x: (B, 784) -> (B, 1) float32.

    w1: (784, 128)  (transpose of torch's (128, 784) Linear weight)
    b1: (128,)      w2: (1, 128) (torch Linear(128,1).weight layout)   b2: (1,)

    tb: batch tile (sweep 512-2048; multiple of 8). x_buffers: pipeline depth
    for the x stream (set 3 only if a trace shows exposed DMA). core_parallel:
    mark the batch axis CORE_PARALLEL for v7x dual-TensorCore sharding when
    the grid has >= 2 tiles.
    """
    B, K = x.shape
    assert K == 784, f"expected 784 input features, got {K}"

    # Batch tile: multiple of 8 sublanes, capped at `tb` rows. Double-buffered
    # f32 x tiles + resident weights + f32 h intermediate stay far under the
    # scoped VMEM limit on v5e / v6e / v7x for tb <= ~4096.
    TB = min(tb, _round_up(B, 8))
    B_pad = _round_up(B, TB)
    if B_pad != B:
        x = jnp.pad(x, ((0, B_pad - B), (0, 0)))

    # Only the tiny resident W1 is pre-cast to bf16 (one-time ~0.4 MB pass);
    # the dominant x stream is read by the kernel in its native dtype.
    w1_bf16 = jnp.asarray(w1).astype(jnp.bfloat16)
    b1_row = jnp.asarray(b1, jnp.float32).reshape(1, 128)
    w2_row = jnp.asarray(w2, jnp.float32).reshape(1, 128)
    b2_s = jnp.asarray(b2, jnp.float32).reshape(1)

    grid = (B_pad // TB,)
    x_bytes_per_elem = jnp.dtype(x.dtype).itemsize

    cost = pl.CostEstimate(
        flops=2 * B_pad * 784 * 128 + 3 * B_pad * 128,
        transcendentals=B_pad,  # sigmoid
        bytes_accessed=(B_pad * 784 * x_bytes_per_elem   # x (native dtype)
                        + 784 * 128 * 2                  # w1 (bf16)
                        + 2 * 128 * 4 + 4                # b1, w2 row, b2
                        + B_pad * 4),                    # output
    )

    # x BlockSpec: optionally deepen pipelining on the x stream only.
    x_spec_kwargs = {}
    if x_buffers != 2:
        x_spec_kwargs["pipeline_mode"] = pl.Buffered(x_buffers)
    x_spec = pl.BlockSpec((TB, 784), lambda i: (i, 0), **x_spec_kwargs)

    batch_semantics = pltpu.CORE_PARALLEL if core_parallel else "parallel"

    out = pl.pallas_call(
        _discriminator_kernel,
        out_shape=jax.ShapeDtypeStruct((B_pad, 1), jnp.float32),
        grid_spec=pltpu.PrefetchScalarGridSpec(
            num_scalar_prefetch=0,
            grid=grid,
            in_specs=[
                x_spec,                                         # x: batch-tiled
                pl.BlockSpec((784, 128), lambda i: (0, 0)),     # w1: resident
                pl.BlockSpec((1, 128), lambda i: (0, 0)),       # b1: resident
                pl.BlockSpec((1, 128), lambda i: (0, 0)),       # w2: resident
                pl.BlockSpec(memory_space=pltpu.MemorySpace.SMEM),  # b2 scalar
            ],
            out_specs=pl.BlockSpec((TB, 1), lambda i: (i, 0)),
        ),
        compiler_params=pltpu.CompilerParams(
            dimension_semantics=(batch_semantics,),  # batch tiles independent
            # Explicit scoped-VMEM limit so a tb sweep up to ~4096 rows does
            # not trip v5e's 16 MiB default; 32 MiB is safe on v5e/v6e/v7x.
            vmem_limit_bytes=32 * 1024 * 1024,
        ),
        cost_estimate=cost,
    )(x, w1_bf16, b1_row, w2_row, b2_s)

    return out[:B]


def init_params(key):
    """Parameter shapes matching the PyTorch module (Linear weights stored so
    the kernel multiplies x @ W1 directly; W2 kept as torch's (1, 128) row)."""
    k1, k2, k3, k4 = jax.random.split(key, 4)
    bound1 = 1.0 / jnp.sqrt(784.0)
    bound2 = 1.0 / jnp.sqrt(128.0)
    w1 = jax.random.uniform(k1, (784, 128), jnp.float32, -bound1, bound1)
    b1 = jax.random.uniform(k2, (128,), jnp.float32, -bound1, bound1)
    w2 = jax.random.uniform(k3, (1, 128), jnp.float32, -bound2, bound2)
    b2 = jax.random.uniform(k4, (1,), jnp.float32, -bound2, bound2)
    return w1, b1, w2, b2


if __name__ == "__main__":
    key = jax.random.PRNGKey(0)
    k_x, k_p = jax.random.split(key)

    B = 8  # small demo batch
    x = jax.random.normal(k_x, (B, 784), jnp.float32)
    w1, b1, w2, b2 = init_params(k_p)

    out = discriminator_forward(x, w1, b1, w2, b2)
    out = jax.block_until_ready(out)

    # Pure-JAX reference with the same bf16-matmul / f32-epilogue recipe the
    # kernel uses (deliberate precision reduction vs the f32 PyTorch module).
    h_ref = jnp.dot(x.astype(jnp.bfloat16), w1.astype(jnp.bfloat16),
                    preferred_element_type=jnp.float32) + b1.reshape(1, 128)
    h_ref = jnp.maximum(h_ref, 0.0)
    ref = jax.nn.sigmoid(h_ref @ w2.reshape(1, 128).T + b2.reshape(1, 1))

    assert out.shape == (B, 1)
    assert jnp.allclose(out, ref, atol=1e-3, rtol=1e-3), (
        f"max abs diff = {jnp.max(jnp.abs(out - ref))}")

    print("KERNEL_OK")
</pallas_src>

<mosaic_0001>
module attributes {stable_mosaic.version = 11 : i64} {
  func.func @_discriminator_kernel(%arg0: i32, %arg1: memref<8x784xf32, #tpu.memory_space<vmem>>, %arg2: memref<784x128xbf16, #tpu.memory_space<vmem>>, %arg3: memref<1x128xf32, #tpu.memory_space<vmem>>, %arg4: memref<1x128xf32, #tpu.memory_space<vmem>>, %arg5: memref<1xf32, #tpu.memory_space<smem>>, %arg6: memref<8x1xf32, #tpu.memory_space<vmem>>) attributes {dimension_semantics = [#tpu.dimension_semantics<parallel>], iteration_bounds = array<i64: 1>, scalar_prefetch = 0 : i64, scratch_operands = 0 : i64, tpu.core_type = #tpu.core_type<tc>, window_params = [{transform_indices = @transform_0, window_bounds = array<i64: 8, 784>}, {pipeline_mode = #tpu.pipeline_mode<synchronous>, transform_indices = @transform_1, window_bounds = array<i64: 784, 128>}, {pipeline_mode = #tpu.pipeline_mode<synchronous>, transform_indices = @transform_2, window_bounds = array<i64: 1, 128>}, {pipeline_mode = #tpu.pipeline_mode<synchronous>, transform_indices = @transform_3, window_bounds = array<i64: 1, 128>}, {transform_indices = @transform_4, window_bounds = array<i64: 1>}, {transform_indices = @transform_5, window_bounds = array<i64: 8, 1>}]} {
    %c0 = arith.constant 0 : index
    %c0_0 = arith.constant 0 : index
    %0 = vector.load %arg1[%c0, %c0_0] : memref<8x784xf32, #tpu.memory_space<vmem>>, vector<8x784xf32>
    %1 = arith.truncf %0 : vector<8x784xf32> to vector<8x784xbf16>
    %c0_1 = arith.constant 0 : index
    %c0_2 = arith.constant 0 : index
    %2 = vector.load %arg2[%c0_1, %c0_2] : memref<784x128xbf16, #tpu.memory_space<vmem>>, vector<784x128xbf16>
    %cst = arith.constant dense<0.000000e+00> : vector<8x128xf32>
    %3 = tpu.matmul %1, %2, %cst {dimension_numbers = #tpu.dot_dimension_numbers<[1], [0], [0], [1], [0, 0, 1, 1], [], []>} : vector<8x784xbf16>, vector<784x128xbf16>, vector<8x128xf32> -> vector<8x128xf32>
    %c0_3 = arith.constant 0 : index
    %c0_4 = arith.constant 0 : index
    %4 = vector.load %arg3[%c0_3, %c0_4] : memref<1x128xf32, #tpu.memory_space<vmem>>, vector<1x128xf32>
    %5 = vector.broadcast %4 : vector<1x128xf32> to vector<8x128xf32>
    %6 = arith.addf %3, %5 : vector<8x128xf32>
    %cst_5 = arith.constant 0.000000e+00 : f32
    %7 = vector.broadcast %cst_5 : f32 to vector<8x128xf32>
    %8 = arith.maximumf %6, %7 : vector<8x128xf32>
    %c0_6 = arith.constant 0 : index
    %c0_7 = arith.constant 0 : index
    %9 = vector.load %arg4[%c0_6, %c0_7] : memref<1x128xf32, #tpu.memory_space<vmem>>, vector<1x128xf32>
    %10 = vector.broadcast %9 : vector<1x128xf32> to vector<8x128xf32>
    %11 = arith.mulf %8, %10 : vector<8x128xf32>
    %cst_8 = arith.constant dense<0.000000e+00> : vector<8xf32>
    %12 = vector.multi_reduction <add>, %11, %cst_8 [1] : vector<8x128xf32> to vector<8xf32>
    %13 = vector.shape_cast %12 : vector<8xf32> to vector<8x1xf32>
    %c0_9 = arith.constant 0 : index
    %14 = memref.load %arg5[%c0_9] : memref<1xf32, #tpu.memory_space<smem>>
    %15 = vector.broadcast %14 : f32 to vector<8x1xf32>
    %16 = arith.addf %13, %15 : vector<8x1xf32>
    %17 = arith.negf %16 : vector<8x1xf32>
    %18 = math.exp %17 : vector<8x1xf32>
    %cst_10 = arith.constant 1.000000e+00 : f32
    %19 = vector.broadcast %cst_10 : f32 to vector<8x1xf32>
    %20 = arith.addf %19, %18 : vector<8x1xf32>
    %21 = arith.divf %19, %20 : vector<8x1xf32>
    %c0_11 = arith.constant 0 : index
    %c0_12 = arith.constant 0 : index
    %22 = vector.load %arg6[%c0_11, %c0_12] : memref<8x1xf32, #tpu.memory_space<vmem>>, vector<8x1xf32>
    tpu.vector_store %arg6[%c0_11, %c0_12], %21 {strides = array<i32>} : memref<8x1xf32, #tpu.memory_space<vmem>>, vector<8x1xf32>,
    return
  }
  func.func @transform_0(%arg0: i32) -> (i32, i32) {
    %c0_i32 = arith.constant 0 : i32
    %c0_i32_0 = arith.constant 0 : i32
    return %arg0, %c0_i32 : i32, i32
  }
  func.func @transform_1(%arg0: i32) -> (i32, i32) {
    %c0_i32 = arith.constant 0 : i32
    %c0_i32_0 = arith.constant 0 : i32
    %c0_i32_1 = arith.constant 0 : i32
    return %c0_i32, %c0_i32_0 : i32, i32
  }
  func.func @transform_2(%arg0: i32) -> (i32, i32) {
    %c0_i32 = arith.constant 0 : i32
    %c0_i32_0 = arith.constant 0 : i32
    %c0_i32_1 = arith.constant 0 : i32
    return %c0_i32, %c0_i32_0 : i32, i32
  }
  func.func @transform_3(%arg0: i32) -> (i32, i32) {
    %c0_i32 = arith.constant 0 : i32
    %c0_i32_0 = arith.constant 0 : i32
    %c0_i32_1 = arith.constant 0 : i32
    return %c0_i32, %c0_i32_0 : i32, i32
  }
  func.func @transform_4(%arg0: i32) -> i32 {
    %c0_i32 = arith.constant 0 : i32
    %c0_i32_0 = arith.constant 0 : i32
    return %c0_i32 : i32
  }
  func.func @transform_5(%arg0: i32) -> (i32, i32) {
    %c0_i32 = arith.constant 0 : i32
    %c0_i32_0 = arith.constant 0 : i32
    return %arg0, %c0_i32 : i32, i32
  }
}

</mosaic_0001>

<bundles_post_ra>
// kernel: tpu_custom_call.1
= control target key start
LH: loop header
LB: loop body
LE: loop exit
PB: predicated region body
PF: predicated region fallthrough
CT: control target
= control target key end

     0   :  { %11 = vsyncpa [#allocation4], 0  ;;  %s937_s0 = inlined_call_operand.hbm [shape: f32[8,784], index: 0, kind: input, shape index: {}]   ;;  %s938_s1 = inlined_call_operand.hbm [shape: bf16[784,128], index: 1, kind: input, shape index: {}]   ;;  %s939_s2 = inlined_call_operand.vmem [shape: f32[1,128], index: 2, kind: input, shape index: {}]   ;;  %s940_s3 = inlined_call_operand.vmem [shape: f32[1,128], index: 3, kind: input, shape index: {}]   ;;  %s941_s4 = inlined_call_operand.<no memory space> [shape: f32[1], index: 4, kind: input, shape index: {}]   ;;  %s942_s5 = inlined_call_operand.vmem [shape: f32[8,1], index: 5, kind: output, shape index: {}]  }
   0x1   :  { %12 = vsyncpa [#allocation6], 0  ;;  %s883_s18 = smov [#allocation3]   ;;  %s884_s20 = smov [#allocation5]  }
   0x2   :  { %s19_s19 = sshll.u32 %s883_s18, 4  ;;  %s28_s21 = sshll.u32 %s884_s20, 4  ;;  %s20_s19 = int_to_ptr.vmem [resolvable:$true] %s19_s19  ;;  %s29_s21 = int_to_ptr.vmem [resolvable:$true] %s28_s21 }
   0x3   :  { %s847_s22 = scalar_lea.vmem %s20_s19, 896  ;;  %p852_p1 = scmp.lt.s32.totalorder %s20_s19, %s20_s19 }
   0x4   :  { %p848_p0 = scmp.ne.s32.totalorder %s20_s19, %s847_s22  ;;  %p853_p2 = scmp.lt.s32.totalorder %s847_s22, %s847_s22 }
   0x6   :  { %p854_p3 = por %p853_p2, %p852_p1 }
   0x8   :  { %p855_p4 = pnand %p854_p3, %p848_p0 }
   0xa   :  { %858 = shalt.err (!%p855_p4)
}
   0xb   :  { %22 = dma.hbm_to_vmem [thread:$0]  %s937_s0, 896, %s20_s19, [#allocation4]  }
   0xc   :  { %s867_s25 = scalar_lea.vmem %s29_s21, 6272  ;;  %p872_p6 = scmp.lt.s32.totalorder %s29_s21, %s29_s21 }
   0xd   :  { %p868_p5 = scmp.ne.s32.totalorder %s29_s21, %s867_s25  ;;  %p873_p7 = scmp.lt.s32.totalorder %s867_s25, %s867_s25 }
   0xf   :  { %p874_p8 = por %p873_p7, %p872_p6 }
  0x11   :  { %p875_p9 = pnand %p874_p8, %p868_p5 }
  0x13   :  { %878 = shalt.err (!%p875_p9)
}
  0x14   :  { %s885_s26 = smov 64   ;;  %s886_s27 = smov 4  }
  0x15   :  { %34 = dma.hbm_to_vmem [thread:$0]  %s938_s1, 6272, %s29_s21, [#allocation6], %s885_s26, %s885_s26, %s886_s27  }
  0x16   :  { %879 = dma.done.wait [#allocation4], 896  }
  0x17   :  { %880 = vsyncadd [#allocation4], 4294966400 }
  0x18   :  { %881 = dma.done.wait [#allocation6], 6272  }
  0x19   :  { %882 = vsyncadd [#allocation6], 4294961024  ;;  %v786_v0 = vld [vmem:[#allocation5 + $0x78] sm:$0xff]   ;;  %v790_v4 = vld [vmem:[#allocation5 + $0x70] sm:$0xff]   ;;  %v887_v44 = vmov 0.0   ;;  %vm888_vm0 = vmmov 0  }
  0x1a   :  { %v787_v1 = vld [vmem:[#allocation5 + $0x38] sm:$0xff]   ;;  %706 = vmatprep.subr.bf16.mxu0 %v786_v0  ;;  %v791_v5 = vld [vmem:[#allocation5 + $0x30] sm:$0xff]   ;;  %v794_v8 = vld [vmem:[#allocation5 + $0x68] sm:$0xff]   ;;  %vm461_vm1 = vcmask 130048   ;;  %vm645_vm2 = vcmask 7168  }
  0x1b   :  { %v788_v2 = vld [vmem:[#allocation5 + $0xf8] sm:$0xff]   ;;  %707 = vmatpush3.bf16.msra.mxu0 %v787_v1  ;;  %v792_v6 = vld [vmem:[#allocation5 + $0xf0] sm:$0xff]   ;;  %v795_v9 = vld [vmem:[#allocation5 + $0x28] sm:$0xff]  }
  0x1c   :  { %v789_v3 = vld [vmem:[#allocation5 + $0xb8] sm:$0xff]   ;;  %728 = vmatprep.subr.bf16.mxu1 %v788_v2  ;;  %708 = vmatprep.subr.bf16.mxu0 %v790_v4  ;;  %v793_v7 = vld [vmem:[#allocation5 + $0xb0] sm:$0xff]   ;;  %v796_v10 = vld [vmem:[#allocation5 + $0xe8] sm:$0xff]  }
  0x1d   :  { %729 = vmatpush3.bf16.msra.mxu1 %v789_v3  ;;  %v797_v11 = vld [vmem:[#allocation5 + $0xa8] sm:$0xff]   ;;  %v798_v12 = vld [vmem:[#allocation5 + $0x60] sm:$0xff]   ;;  %v802_v16 = vld [vmem:[#allocation5 + $0x58] sm:$0xff]  }
  0x1e   :  { %730 = vmatprep.subr.bf16.mxu1 %v792_v6  ;;  %v799_v13 = vld [vmem:[#allocation5 + $0x20] sm:$0xff]   ;;  %v803_v17 = vld [vmem:[#allocation5 + $0x18] sm:$0xff]   ;;  %v806_v20 = vld [vmem:[#allocation5 + $0x50] sm:$0xff]  }
  0x1f   :  { %709 = vmatpush3.bf16.msra.mxu0 %v791_v5  ;;  %v800_v14 = vld [vmem:[#allocation5 + $0xe0] sm:$0xff]   ;;  %v804_v18 = vld [vmem:[#allocation5 + $0xd8] sm:$0xff]   ;;  %v807_v21 = vld [vmem:[#allocation5 + $0x10] sm:$0xff]  }
  0x20   :  { %710 = vmatprep.subr.bf16.mxu0 %v794_v8  ;;  %v801_v15 = vld [vmem:[#allocation5 + $0xa0] sm:$0xff]   ;;  %v805_v19 = vld [vmem:[#allocation5 + $0x98] sm:$0xff]   ;;  %v808_v22 = vld [vmem:[#allocation5 + $0xd0] sm:$0xff]  }
  0x21   :  { %731 = vmatpush3.bf16.msra.mxu1 %v793_v7  ;;  %v809_v23 = vld [vmem:[#allocation5 + $0x90] sm:$0xff]   ;;  %v810_v24 = vld [vmem:[#allocation5 + $0x48] sm:$0xff]   ;;  %v814_v28 = vld [vmem:[#allocation5 + $0x40] sm:$0xff]  }
  0x22   :  { %732 = vmatprep.subr.bf16.mxu1 %v796_v10  ;;  %v811_v25 = vld [vmem:[#allocation5 + $0x8] sm:$0xff]   ;;  %v815_v29 = vld [vmem:[#allocation5] sm:$0xff]   ;;  %v49_v31 = vld [vmem:[#allocation3 + $0x8] sm:$0xff] }
  0x23   :  { %711 = vmatpush3.bf16.msra.mxu0 %v795_v9  ;;  %v812_v26 = vld [vmem:[#allocation5 + $0xc8] sm:$0xff]   ;;  %v816_v30 = vld [vmem:[#allocation5 + $0xc0] sm:$0xff]   ;;  %v56_v32 = vpack.c.bf16 %v49_v31, %v49_v31  ;;  %v818_v36 = vld [vmem:[#allocation5 + $0x178] sm:$0xff]  }
  0x24   :  { %712 = vmatprep.subr.bf16.mxu0 %v798_v12  ;;  %v813_v27 = vld [vmem:[#allocation5 + $0x88] sm:$0xff]   ;;  %v817_v33 = vld [vmem:[#allocation5 + $0x80] sm:$0xff]   ;;  %v819_v39 = vld [vmem:[#allocation5 + $0x138] sm:$0xff]  }
  0x25   :  { %733 = vmatpush3.bf16.msra.mxu1 %v797_v11  ;;  %v48_v34 = vld [vmem:[#allocation3] sm:$0xff]  ;;  %v51_v37 = vld [vmem:[#allocation3 + $0x18] sm:$0xff]  ;;  %497 = vmatprep.mubr.bf16.mxu0 %v56_v32  ;;  %v50_v40 = vld [vmem:[#allocation3 + $0x10] sm:$0xff] }
  0x26   :  { %734 = vmatprep.subr.bf16.mxu1 %v800_v14  ;;  %v55_v35 = vpack.c.bf16 %v48_v34, %v48_v34  ;;  %v58_v38 = vpack.c.bf16 %v51_v37, %v51_v37  ;;  %v57_v41 = vpack.c.bf16 %v50_v40, %v50_v40  ;;  %v820_v42 = vld [vmem:[#allocation5 + $0x170] sm:$0xff]   ;;  %v822_v45 = vld [vmem:[#allocation5 + $0x168] sm:$0xff]   ;;  %v824_v47 = vld [vmem:[#allocation5 + $0x160] sm:$0xff]  }
  0x27   :  { %713 = vmatpush3.bf16.msra.mxu0 %v799_v13  ;;  %v821_v43 = vld [vmem:[#allocation5 + $0x130] sm:$0xff]   ;;  %v823_v46 = vld [vmem:[#allocation5 + $0x128] sm:$0xff]   ;;  %v825_v48 = vld [vmem:[#allocation5 + $0x120] sm:$0xff]  }
  0x28   :  { %714 = vmatprep.subr.bf16.mxu0 %v802_v16  ;;  %537 = vmatprep.mubr.bf16.mxu1 %v58_v38  ;;  %v826_v49 = vld [vmem:[#allocation5 + $0x158] sm:$0xff]   ;;  %v828_v51 = vld [vmem:[#allocation5 + $0x150] sm:$0xff]   ;;  %v834_v52 = vld [vmem:[#allocation5 + $0x180] sm:$0xff]  }
  0x29   :  { %735 = vmatpush3.bf16.msra.mxu1 %v801_v15  ;;  %v827_v50 = vld [vmem:[#allocation5 + $0x118] sm:$0xff]   ;;  %v53_v53 = vld [vmem:[#allocation3 + $0x28] sm:$0xff]  ;;  %v830_v58 = vld [vmem:[#allocation5 + $0x148] sm:$0xff]  }
  0x2a   :  { %736 = vmatprep.subr.bf16.mxu1 %v804_v18  ;;  %v60_v54 = vpack.c.bf16 %v53_v53, %v53_v53  ;;  %v54_v55 = vld [vmem:[#allocation3 + $0x30] sm:$0xff]  ;;  %v829_v56 = vld [vmem:[#allocation5 + $0x110] sm:$0xff]   ;;  %v831_v59 = vld [vmem:[#allocation5 + $0x108] sm:$0xff]  }
  0x2b   :  { %715 = vmatpush3.bf16.msra.mxu0 %v803_v17  ;;  %v61_v57 = vpack.c.bf16 %v54_v55, %v54_v55  ;;  %v832_v60 = vld [vmem:[#allocation5 + $0x140] sm:$0xff]   ;;  %v52_v62 = vld [vmem:[#allocation3 + $0x20] sm:$0xff] }
  0x2c   :  { %716 = vmatprep.subr.bf16.mxu0 %v806_v20  ;;  %v833_v61 = vld [vmem:[#allocation5 + $0x100] sm:$0xff]   ;;  %v59_v63 = vpack.c.bf16 %v52_v62, %v52_v62  ;;  %v653_v13 = vld [vmem:[%s939_s2] ss:$0 sm:$0xff] }
  0x2d   :  { %737 = vmatpush3.bf16.msra.mxu1 %v805_v19 }
  0x2e   :  { %738 = vmatprep.subr.bf16.mxu1 %v808_v22 }
  0x2f   :  { %717 = vmatpush3.bf16.msra.mxu0 %v807_v21 }
  0x30   :  { %718 = vmatprep.subr.bf16.mxu0 %v810_v24  ;;  %v704_v24 = vld [vmem:[%s940_s3] ss:$0 sm:$0xff] }
  0x31   :  { %739 = vmatpush3.bf16.msra.mxu1 %v809_v23 }
  0x32   :  { %740 = vmatprep.subr.bf16.mxu1 %v812_v26 }
  0x33   :  { %719 = vmatpush3.bf16.msra.mxu0 %v811_v25 }
  0x34   :  { %720 = vmatprep.subr.bf16.mxu0 %v814_v28 }
  0x35   :  { %741 = vmatpush3.bf16.msra.mxu1 %v813_v27  ;;  %v637_v27 = vstv %s941_s4 }
  0x36   :  { %742 = vmatprep.subr.bf16.mxu1 %v816_v30 }
  0x37   :  { %721 = vmatpush3.bf16.msra.mxu0 %v815_v29 }
  0x38   :  { %750 = vmatprep.subr.bf16.mxu0 %v818_v36 }
  0x39   :  { %743 = vmatpush3.bf16.msra.mxu1 %v817_v33 }
  0x3a   :  { %498 = vmatmul.mubr.bf16.vlgmr.msra.gmra.mxu0 %v55_v35  ;;  %774 = vmatprep.subr.bf16.mxu1 %v887_v44 }
  0x3b   :  { %751 = vmatpush3.bf16.msra.mxu0 %v819_v39  ;;  %577 = vmatprep.mubr.bf16.mxu0 %v60_v54 }
  0x3c   :  { %538 = vmatmul.mubr.bf16.vlgmr.msra.gmra.mxu1 %v57_v41  ;;  %752 = vmatprep.subr.bf16.mxu0 %v820_v42 }
  0x3d   :  { %776 = vmatprep.mubr.msk.bf16.mxu1 %vm888_vm0, %v887_v44  ;;  %775 = vmatpush3.bf16.msra.mxu1 %v834_v52 }
  0x3f   :  { %753 = vmatpush3.bf16.msra.mxu0 %v821_v43 }
  0x40   :  { %754 = vmatprep.subr.bf16.mxu0 %v822_v45 }
  0x43   :  { %755 = vmatpush3.bf16.msra.mxu0 %v823_v46 }
  0x44   :  { %756 = vmatprep.subr.bf16.mxu0 %v824_v47  ;;  %777 = vmatmul.mubr.msk.bf16.vlgmr.msra.gmra.mxu1 %vm461_vm1, %v61_v57 }
  0x47   :  { %757 = vmatpush3.bf16.msra.mxu0 %v825_v48 }
  0x48   :  { %758 = vmatprep.subr.bf16.mxu0 %v826_v49 }
  0x4b   :  { %759 = vmatpush3.bf16.msra.mxu0 %v827_v50 }
  0x4c   :  { %760 = vmatprep.subr.bf16.mxu0 %v828_v51 }
  0x4f   :  { %761 = vmatpush3.bf16.msra.mxu0 %v829_v56 }
  0x50   :  { %762 = vmatprep.subr.bf16.mxu0 %v830_v58 }
  0x53   :  { %763 = vmatpush3.bf16.msra.mxu0 %v831_v59 }
  0x54   :  { %764 = vmatprep.subr.bf16.mxu0 %v832_v60 }
  0x57   :  { %765 = vmatpush3.bf16.msra.mxu0 %v833_v61 }
  0x5a   :  { %578 = vmatmul.mubr.bf16.vlgmr.msra.gmra.mxu0 %v59_v63 }
  0xfa   :  { %v722_v0 = vpop.f32.mrf.mxu0 }
  0xfc   :  { %v723_v1 = vpop.f32.mrf.mxu0  ;;  %v744_v2 = vpop.f32.mrf.mxu1 }
  0xfd   :  { %v724_v12 = vadd.f32 %v723_v1, %v722_v0 }
  0xfe   :  { %v725_v3 = vpop.f32.mrf.mxu0  ;;  %v745_v4 = vpop.f32.mrf.mxu1 }
  0xff   :  { %v500_v14 = vadd.f32 %v724_v12, %v653_v13  ;;  %v746_v15 = vadd.f32 %v745_v4, %v744_v2 }
 0x100   :  { %v726_v5 = vpop.f32.mrf.mxu0  ;;  %v747_v6 = vpop.f32.mrf.mxu1 }
 0x101   :  { %v540_v18 = vadd.f32 %v746_v15, %v500_v14 }
 0x102   :  { %v748_v7 = vpop.f32.mrf.mxu1 }
 0x104   :  { %v619_v8 = vpop.f32.mrf.mxu1 }
 0x106   :  { %v778_v9 = vpop.f32.mrf.mxu1 }
 0x108   :  { %v622_v10 = vpop.f32.mrf.mxu1 }
 0x10a   :  { %v779_v11 = vpop.f32.mrf.mxu1 }
 0x11a   :  { %v766_v16 = vpop.f32.mrf.mxu0 }
 0x11c   :  { %v767_v17 = vpop.f32.mrf.mxu0 }
 0x11d   :  { %v768_v19 = vadd.f32 %v767_v17, %v766_v16 }
 0x11e   :  { %v769_v20 = vpop.f32.mrf.mxu0 }
 0x11f   :  { %v580_v21 = vadd.f32 %v768_v19, %v540_v18 }
 0x120   :  { %v770_v22 = vpop.f32.mrf.mxu0 }
 0x121   :  { %v620_v23 = vadd.f32 %v619_v8, %v580_v21 }
 0x123   :  { %v625_v25 = vmax.f32 %v620_v23, 0.0 }
 0x125   :  { %v633_v26 = vmul.f32 %v704_v24, %v625_v25 }
 0x127   :  { %634 = vadd.xlane.f32.xlu0 %v633_v26 }
 0x1b0   :  { %v635_v28 = vpop.xlane.xlu0 %634 }
 0x1b1   :  { %v638_v29 = vadd.f32 %v637_v27, %v635_v28 }
 0x1b3   :  { %v705_v30 = vmul.f32 -1.442695, %v638_v29 }
 0x1b5   :  { %835 = vpow2.f32 %v705_v30 }
 0x1c2   :  { %v836_v31 = vpop.eup %835 }
 0x1c3   :  { %v642_v32 = vadd.f32 1.0, %v836_v31 }
 0x1c5   :  { %837 = vrcp.f32 %v642_v32 }
 0x1d2   :  { %v838_v33 = vpop.eup %837 }
 0x1d3   :  { %646 = vst.msk [vmem:[%s942_s5] sm:$0xff] %vm645_vm2, %v838_v33 }
 0x1d4   :  { %651 = vsyncpa [#allocation4], 1 }
 0x1d5   :  { %652 = vsyncpa [#allocation6], 1 }

</bundles_post_ra>
